<compile_context>
chip_gen: v5e
topology: v5e:2x2
jax: 0.10.0
libtpu: 0.0.40
codegen_flags: <defaults>
</compile_context>

<pallas_src>
import numpy as np
import jax
import jax.numpy as jnp
from jax.experimental import pallas as pl
from jax.experimental.pallas import tpu as pltpu

F1 = 32        # true width of conv1 output
F2 = 64        # true width of conv2 output
F_PAD = 128    # lane-dense padded feature width used everywhere inside the kernels


# -----------------------------------------------------------------------------------
# Hardware-aware sizing
# -----------------------------------------------------------------------------------
def _vmem_budget_bytes():
    """~80% of physical per-core VMEM (never the full 64 MiB on v7x; ~102 MiB on the
    128 MiB v5e/v6e parts)."""
    try:
        cap = int(pltpu.get_tpu_info().vmem_capacity_bytes)
    except Exception:
        cap = 64 * 1024 * 1024          # conservative fallback (v7x-sized)
    return int(cap * 0.80)


def _choose_tiles(n, budget, tm=None):
    """Pick the row-tile size tm (multiple of 128) and node padding (multiple of tm).

    N is padded to a multiple of 128 so every bf16 A block satisfies the (16,128) min
    tile with no masked lanes/sublanes."""
    n_pad128 = max(128, ((n + 127) // 128) * 128)
    if tm is None:
        tm = 128
        for cand in (512, 256, 128):
            # double-buffered (tm, N) bf16 A tiles must fit well inside the budget
            if 2 * cand * n_pad128 * 2 <= 0.40 * budget:
                tm = cand
                break
    tm = min(tm, n_pad128)
    assert tm % 128 == 0
    n_pad = max(tm, ((n + tm - 1) // tm) * tm)
    return n_pad, tm


# -----------------------------------------------------------------------------------
# Resident-A path: one kernel, A read from HBM exactly once (manual double-buffer DMA)
# -----------------------------------------------------------------------------------
def _make_resident_kernel(n_pad, tm):
    t = n_pad // tm

    def kernel(x_ref, w1_ref, b1_ref, w2_ref, b2_ref, wf_ref, bf_ref,   # VMEM inputs
               a_hbm,                                                    # HBM (pl.ANY)
               out_ref,                                                  # VMEM output
               a_scr, xw1_scr, xw2_scr, sem):                            # scratch

        def start_chunk(i, slot):
            pltpu.make_async_copy(a_hbm.at[pl.ds(i * tm, tm), :],
                                  a_scr.at[i], sem.at[slot]).start()

        def wait_chunk(slot):
            # wait only needs the transfer size + semaphore; a static same-size slice
            pltpu.make_async_copy(a_hbm.at[pl.ds(0, tm), :],
                                  a_scr.at[0], sem.at[slot]).wait()

        # Prime the pipeline: chunks 0 (and 1) are in flight before any compute.
        start_chunk(0, 0)
        if t > 1:
            start_chunk(1, 1)

        # conv1 feature transform: contraction dim == 1 -> VPU broadcast outer product
        # (no wasted MXU pass); stored once in bf16.
        xw1_scr[...] = (x_ref[...] * w1_ref[...]).astype(jnp.bfloat16)

        # ---- layer 1: h1 = relu(A @ xw1 + b1);  xw2 = h1 @ W2 (chunked over rows) ---
        @pl.loop(0, t)
        def _(i):
            slot = i % 2
            wait_chunk(slot)

            @pl.when(i + 2 < t)
            def _():
                start_chunk(i + 2, slot)   # prefetch: overlaps the DMA with this chunk

            h1 = jnp.dot(a_scr[i], xw1_scr[...],
                         preferred_element_type=jnp.float32) + b1_ref[...]
            h1 = jnp.maximum(h1, 0.0).astype(jnp.bfloat16)     # f32 ReLU, bf16 storage
            off = pl.multiple_of(i * tm, tm)
            xw2_scr[pl.ds(off, tm), :] = jnp.dot(
                h1, w2_ref[...], preferred_element_type=jnp.float32
            ).astype(jnp.bfloat16)

        # ---- layer 2 + fc2: A already resident in VMEM -> zero extra HBM traffic ----
        @pl.loop(0, t)
        def _(i):
            h2 = jnp.dot(a_scr[i], xw2_scr[...],
                         preferred_element_type=jnp.float32) + b2_ref[...]
            h2 = jnp.maximum(h2, 0.0).astype(jnp.bfloat16)
            off = pl.multiple_of(i * tm, tm)
            # wf is (128,128) bf16 with the real (64,1) weights in column 0 -> bf16 MXU
            # matmul and a lane-dense (tm,128) store (result sliced in the wrapper).
            out_ref[pl.ds(off, tm), :] = jnp.dot(
                h2, wf_ref[...], preferred_element_type=jnp.float32) + bf_ref[...]

    return kernel


def _forward_resident(x_p, a_p, params, n_pad, tm, budget):
    w1, b1, w2, b2, wf, bf = params
    t = n_pad // tm
    vmem = pl.BlockSpec(memory_space=pltpu.MemorySpace.VMEM)
    return pl.pallas_call(
        _make_resident_kernel(n_pad, tm),
        out_shape=jax.ShapeDtypeStruct((n_pad, F_PAD), jnp.float32),
        in_specs=[vmem] * 7 + [pl.BlockSpec(memory_space=pl.ANY)],
        out_specs=vmem,
        scratch_shapes=[
            pltpu.VMEM((t, tm, n_pad), jnp.bfloat16),   # resident A_hat
            pltpu.VMEM((n_pad, F_PAD), jnp.bfloat16),   # x  @ W1
            pltpu.VMEM((n_pad, F_PAD), jnp.bfloat16),   # h1 @ W2
            pltpu.SemaphoreType.DMA((2,)),
        ],
        compiler_params=pltpu.CompilerParams(vmem_limit_bytes=budget),
    )(x_p, w1, b1, w2, b2, wf, bf, a_p)


# -----------------------------------------------------------------------------------
# Streamed path (A too large for VMEM): two gridded passes, A auto-pipelined row tiles
# -----------------------------------------------------------------------------------
def _stream_pass1_kernel(x_ref, w1_ref, b1_ref, a_ref, w2_ref, xw2_ref):
    # xw1 is a rank-1 VPU outer product; recomputed per row tile (trivial filler vs. the
    # HBM-bound A stream) so the row axis can stay "parallel" across TensorCores.
    xw1 = (x_ref[...] * w1_ref[...]).astype(jnp.bfloat16)
    h1 = jnp.dot(a_ref[...], xw1, preferred_element_type=jnp.float32) + b1_ref[...]
    h1 = jnp.maximum(h1, 0.0).astype(jnp.bfloat16)
    xw2_ref[...] = jnp.dot(h1, w2_ref[...],
                           preferred_element_type=jnp.float32).astype(jnp.bfloat16)


def _stream_pass2_kernel(xw2_ref, b2_ref, wf_ref, bf_ref, a_ref, out_ref):
    h2 = jnp.dot(a_ref[...], xw2_ref[...],
                 preferred_element_type=jnp.float32) + b2_ref[...]
    h2 = jnp.maximum(h2, 0.0).astype(jnp.bfloat16)
    out_ref[...] = jnp.dot(h2, wf_ref[...],
                           preferred_element_type=jnp.float32) + bf_ref[...]


def _forward_streamed(x_p, a_p, params, n_pad, tm, budget):
    w1, b1, w2, b2, wf, bf = params
    t = n_pad // tm
    cp = pltpu.CompilerParams(dimension_semantics=("parallel",),
                              vmem_limit_bytes=budget)

    xw2 = pl.pallas_call(
        _stream_pass1_kernel,
        out_shape=jax.ShapeDtypeStruct((n_pad, F_PAD), jnp.bfloat16),
        grid=(t,),
        in_specs=[
            pl.BlockSpec((n_pad, 1), lambda i: (0, 0)),       # x          (resident)
            pl.BlockSpec((1, F_PAD), lambda i: (0, 0)),       # W1
            pl.BlockSpec((1, F_PAD), lambda i: (0, 0)),       # b1
            pl.BlockSpec((tm, n_pad), lambda i: (i, 0)),      # A row tile (streamed)
            pl.BlockSpec((F_PAD, F_PAD), lambda i: (0, 0)),   # W2
        ],
        out_specs=pl.BlockSpec((tm, F_PAD), lambda i: (i, 0)),
        compiler_params=cp,
    )(x_p, w1, b1, a_p, w2)

    return pl.pallas_call(
        _stream_pass2_kernel,
        out_shape=jax.ShapeDtypeStruct((n_pad, F_PAD), jnp.float32),
        grid=(t,),
        in_specs=[
            pl.BlockSpec((n_pad, F_PAD), lambda i: (0, 0)),   # h1 @ W2    (resident)
            pl.BlockSpec((1, F_PAD), lambda i: (0, 0)),       # b2
            pl.BlockSpec((F_PAD, F_PAD), lambda i: (0, 0)),   # Wf (padded to 128 cols)
            pl.BlockSpec((1, F_PAD), lambda i: (0, 0)),       # bf
            pl.BlockSpec((tm, n_pad), lambda i: (i, 0)),      # A row tile (streamed)
        ],
        out_specs=pl.BlockSpec((tm, F_PAD), lambda i: (i, 0)),
        compiler_params=cp,
    )(xw2, b2, wf, bf, a_p)


# -----------------------------------------------------------------------------------
# Wrapper / dispatch
# -----------------------------------------------------------------------------------
def gcnnet_forward(x, a_hat_bf16, params, *, force_streamed=False, tm=None):
    n = x.shape[0]
    budget = _vmem_budget_bytes()
    n_pad, tm = _choose_tiles(n, budget, tm)

    x_p = jnp.pad(x, ((0, n_pad - n), (0, 0))) if n_pad != n else x
    a_p = (jnp.pad(a_hat_bf16, ((0, n_pad - n), (0, n_pad - n)))
           if n_pad != n else a_hat_bf16)

    # resident A (2*N^2 B) + xw1/xw2/out slabs + slack must fit the VMEM budget
    resident_need = (2 * n_pad * n_pad + n_pad * (2 * F_PAD * 2 + F_PAD * 4)
                     + (4 << 20))
    if force_streamed or resident_need > budget:
        out = _forward_streamed(x_p, a_p, params, n_pad, tm, budget)
    else:
        out = _forward_resident(x_p, a_p, params, n_pad, tm, budget)
    return out[:n, :1]


def reference_forward(x, a_bf16, params):
    """Pure-JAX reference with the same dtype strategy (bf16 MXU operands, f32 accum,
    f32 bias/ReLU, bf16 activation storage)."""
    w1, b1, w2, b2, wf, bf = params
    xw1 = (x * w1).astype(jnp.bfloat16)
    h1 = jnp.maximum(jnp.dot(a_bf16, xw1, preferred_element_type=jnp.float32) + b1,
                     0.0).astype(jnp.bfloat16)
    xw2 = jnp.dot(h1, w2, preferred_element_type=jnp.float32).astype(jnp.bfloat16)
    h2 = jnp.maximum(jnp.dot(a_bf16, xw2, preferred_element_type=jnp.float32) + b2,
                     0.0).astype(jnp.bfloat16)
    out = jnp.dot(h2, wf, preferred_element_type=jnp.float32) + bf
    return out[:, :1]


def build_gcn_norm_dense(edge_index, num_nodes):
    """Dense D^{-1/2}(A+I)D^{-1/2}; entry [dst, src] so y = M @ x matches
    MessagePassing(aggr='add') with message = norm * x_j."""
    src, dst = edge_index
    loop = jnp.arange(num_nodes, dtype=src.dtype)          # self loops
    src = jnp.concatenate([src, loop])
    dst = jnp.concatenate([dst, loop])
    w = jnp.ones_like(src, dtype=jnp.float32)
    deg = jnp.zeros((num_nodes,), jnp.float32).at[dst].add(w)
    dinv = jnp.where(deg > 0, 1.0 / jnp.sqrt(deg), 0.0)
    norm = dinv[src] * w * dinv[dst]
    return jnp.zeros((num_nodes, num_nodes), jnp.float32).at[dst, src].add(norm)


def init_params(key):
    k1, k2, k3 = jax.random.split(key, 3)

    def glorot(k, fan_in, fan_out):
        s = float(np.sqrt(6.0 / (fan_in + fan_out)))
        return jax.random.uniform(k, (fan_in, fan_out), jnp.float32, -s, s)

    # GCNConv(1, 32): glorot weight, zero bias (PyG defaults); features padded to 128
    # lanes so every activation tensor is lane-dense.
    w1 = jnp.zeros((1, F_PAD), jnp.float32).at[:, :F1].set(glorot(k1, 1, F1))
    b1 = jnp.zeros((1, F_PAD), jnp.float32)
    # GCNConv(32, 64)
    w2 = jnp.zeros((F_PAD, F_PAD), jnp.float32).at[:F1, :F2].set(glorot(k2, F1, F2))
    b2 = jnp.zeros((1, F_PAD), jnp.float32)
    # fc2 = Linear(64, 1), torch default uniform init; stored as a (128,128) bf16 matrix
    # with the real weights in column 0 so the last matmul is bf16 + lane-dense.
    kw, kb = jax.random.split(k3)
    bound = 1.0 / float(np.sqrt(F2))
    wf = jnp.zeros((F_PAD, F_PAD), jnp.float32).at[:F2, 0:1].set(
        jax.random.uniform(kw, (F2, 1), jnp.float32, -bound, bound))
    bf = jnp.zeros((1, F_PAD), jnp.float32).at[0, 0].set(
        jax.random.uniform(kb, (), jnp.float32, -bound, bound))
    # MXU operands in bf16; w1 stays f32 (VPU outer product, v5e-safe); biases f32.
    return w1, b1, w2.astype(jnp.bfloat16), b2, wf.astype(jnp.bfloat16), bf


def _ring_graph(n, extra_stride=None):
    idx = np.arange(n)
    src = [idx, (idx + 1) % n]
    dst = [(idx + 1) % n, idx]
    if extra_stride is not None:
        src += [idx, (idx + extra_stride) % n]
        dst += [(idx + extra_stride) % n, idx]
    src = np.concatenate(src).astype(np.int32)
    dst = np.concatenate(dst).astype(np.int32)
    return jnp.stack([jnp.asarray(src), jnp.asarray(dst)])


if __name__ == "__main__":
    key = jax.random.PRNGKey(0)
    kx, kp, kx2 = jax.random.split(key, 3)
    params = init_params(kp)

    # ---- small demo graph: 16-node ring (data.x_tmp has shape (N, 1)) ---------------
    n = 16
    x = jax.random.normal(kx, (n, 1), jnp.float32)
    a_hat = build_gcn_norm_dense(_ring_graph(n), n).astype(jnp.bfloat16)
    ref = np.asarray(reference_forward(x, a_hat, params))

    for force_streamed in (False, True):            # exercise both execution paths
        out = gcnnet_forward(x, a_hat, params, force_streamed=force_streamed)
        jax.block_until_ready(out)
        assert out.shape == (n, 1) and out.dtype == jnp.float32
        assert np.allclose(np.asarray(out), ref, atol=5e-3, rtol=5e-3), (
            force_streamed, float(np.max(np.abs(np.asarray(out) - ref))))

    # ---- multi-tile check: several row chunks / grid steps (DMA prefetch + grid) ----
    n2 = 600
    x2 = jax.random.normal(kx2, (n2, 1), jnp.float32)
    a_hat2 = build_gcn_norm_dense(_ring_graph(n2, extra_stride=7), n2).astype(jnp.bfloat16)
    ref2 = np.asarray(reference_forward(x2, a_hat2, params))
    for force_streamed in (False, True):
        out2 = gcnnet_forward(x2, a_hat2, params, force_streamed=force_streamed, tm=128)
        jax.block_until_ready(out2)
        assert out2.shape == (n2, 1)
        assert np.allclose(np.asarray(out2), ref2, atol=5e-3, rtol=5e-3), (
            force_streamed, float(np.max(np.abs(np.asarray(out2) - ref2))))

    print("KERNEL_OK")
</pallas_src>

<mosaic_0001>
module attributes {stable_mosaic.version = 11 : i64} {
  func.func @kernel(%arg0: memref<128x1xf32, #tpu.memory_space<vmem>>, %arg1: memref<1x128xf32, #tpu.memory_space<vmem>>, %arg2: memref<1x128xf32, #tpu.memory_space<vmem>>, %arg3: memref<128x128xbf16, #tpu.memory_space<vmem>>, %arg4: memref<1x128xf32, #tpu.memory_space<vmem>>, %arg5: memref<128x128xbf16, #tpu.memory_space<vmem>>, %arg6: memref<1x128xf32, #tpu.memory_space<vmem>>, %arg7: memref<128x128xbf16, #tpu.memory_space<any>>, %arg8: memref<128x128xf32, #tpu.memory_space<vmem>>, %arg9: memref<1x128x128xbf16, #tpu.memory_space<vmem>>, %arg10: memref<128x128xbf16, #tpu.memory_space<vmem>>, %arg11: memref<128x128xbf16, #tpu.memory_space<vmem>>, %arg12: memref<2x!tpu.dma_semaphore, #tpu.memory_space<semaphore_mem>>) attributes {dimension_semantics = [], scalar_prefetch = 0 : i64, scratch_operands = 4 : i64, tpu.core_type = #tpu.core_type<tc>} {
    %c0_i32 = arith.constant 0 : i32
    %c0_i32_0 = arith.constant 0 : i32
    %c0_i32_1 = arith.constant 0 : i32
    %c0_i32_2 = arith.constant 0 : i32
    %0 = tpu.memref_slice %arg7[%c0_i32_1, %c0_i32_2] : memref<128x128xbf16, #tpu.memory_space<any>> -> memref<128x128xbf16, #tpu.memory_space<any>>
    %c0_i32_3 = arith.constant 0 : i32
    %c0_i32_4 = arith.constant 0 : i32
    %1 = tpu.memref_slice %arg9[%c0_i32, %c0_i32_3, %c0_i32_4] : memref<1x128x128xbf16, #tpu.memory_space<vmem>> -> memref<1x128x128xbf16, #tpu.memory_space<vmem>>
    %2 = tpu.memref_squeeze %1 : memref<1x128x128xbf16, #tpu.memory_space<vmem>> -> memref<128x128xbf16, #tpu.memory_space<vmem>>
    %3 = tpu.memref_slice %arg12[%c0_i32_0] : memref<2x!tpu.dma_semaphore, #tpu.memory_space<semaphore_mem>> -> memref<1x!tpu.dma_semaphore, #tpu.memory_space<semaphore_mem>>
    %4 = tpu.memref_squeeze %3 : memref<1x!tpu.dma_semaphore, #tpu.memory_space<semaphore_mem>> -> memref<!tpu.dma_semaphore, #tpu.memory_space<semaphore_mem>>
    tpu.enqueue_dma source(%0 : memref<128x128xbf16, #tpu.memory_space<any>>) target(%2 : memref<128x128xbf16, #tpu.memory_space<vmem>>) target_semaphore(%4 : memref<!tpu.dma_semaphore, #tpu.memory_space<semaphore_mem>>)
    %c0 = arith.constant 0 : index
    %c0_5 = arith.constant 0 : index
    %5 = vector.load %arg0[%c0, %c0_5] : memref<128x1xf32, #tpu.memory_space<vmem>>, vector<128x1xf32>
    %c0_6 = arith.constant 0 : index
    %c0_7 = arith.constant 0 : index
    %6 = vector.load %arg1[%c0_6, %c0_7] : memref<1x128xf32, #tpu.memory_space<vmem>>, vector<1x128xf32>
    %7 = vector.broadcast %5 : vector<128x1xf32> to vector<128x128xf32>
    %8 = vector.broadcast %6 : vector<1x128xf32> to vector<128x128xf32>
    %9 = arith.mulf %7, %8 : vector<128x128xf32>
    %10 = arith.truncf %9 : vector<128x128xf32> to vector<128x128xbf16>
    %c0_8 = arith.constant 0 : index
    %c0_9 = arith.constant 0 : index
    %11 = vector.load %arg10[%c0_8, %c0_9] : memref<128x128xbf16, #tpu.memory_space<vmem>>, vector<128x128xbf16>
    tpu.vector_store %arg10[%c0_8, %c0_9], %10 {strides = array<i32>} : memref<128x128xbf16, #tpu.memory_space<vmem>>, vector<128x128xbf16>,
    %c0_i32_10 = arith.constant 0 : i32
    %c1_i32 = arith.constant 1 : i32
    %12 = arith.muli %c0_i32_10, %c1_i32 : i32
    %c0_i32_11 = arith.constant 0 : i32
    %13 = arith.addi %c0_i32_11, %12 : i32
    %c2_i32 = arith.constant 2 : i32
    %c0_i32_12 = arith.constant 0 : i32
    %14 = arith.cmpi eq, %c2_i32, %c0_i32_12 : i32
    %c1_i32_13 = arith.constant 1 : i32
    %15 = arith.select %14, %c1_i32_13, %c2_i32 : i32
    %16 = arith.remsi %13, %15 : i32
    %c0_i32_14 = arith.constant 0 : i32
    %17 = arith.cmpi ne, %16, %c0_i32_14 : i32
    %c0_i32_15 = arith.constant 0 : i32
    %18 = arith.cmpi slt, %16, %c0_i32_15 : i32
    %c0_i32_16 = arith.constant 0 : i32
    %19 = arith.cmpi slt, %15, %c0_i32_16 : i32
    %20 = arith.xori %18, %19 : i1
    %21 = arith.andi %20, %17 : i1
    %22 = arith.addi %16, %15 : i32
    %23 = arith.select %21, %22, %16 : i32
    %c0_i32_17 = arith.constant 0 : i32
    %c0_i32_18 = arith.constant 0 : i32
    %c0_i32_19 = arith.constant 0 : i32
    %24 = tpu.memref_slice %arg7[%c0_i32_18, %c0_i32_19] : memref<128x128xbf16, #tpu.memory_space<any>> -> memref<128x128xbf16, #tpu.memory_space<any>>
    %c0_i32_20 = arith.constant 0 : i32
    %c0_i32_21 = arith.constant 0 : i32
    %25 = tpu.memref_slice %arg9[%c0_i32_17, %c0_i32_20, %c0_i32_21] : memref<1x128x128xbf16, #tpu.memory_space<vmem>> -> memref<1x128x128xbf16, #tpu.memory_space<vmem>>
    %26 = tpu.memref_squeeze %25 : memref<1x128x128xbf16, #tpu.memory_space<vmem>> -> memref<128x128xbf16, #tpu.memory_space<vmem>>
    %27 = tpu.memref_slice %arg12[%23] : memref<2x!tpu.dma_semaphore, #tpu.memory_space<semaphore_mem>> -> memref<1x!tpu.dma_semaphore, #tpu.memory_space<semaphore_mem>>
    %28 = tpu.memref_squeeze %27 : memref<1x!tpu.dma_semaphore, #tpu.memory_space<semaphore_mem>> -> memref<!tpu.dma_semaphore, #tpu.memory_space<semaphore_mem>>
    tpu.wait_dma2 semaphore(%28 : memref<!tpu.dma_semaphore, #tpu.memory_space<semaphore_mem>>) src(%24 : memref<128x128xbf16, #tpu.memory_space<any>>) dst(%26 : memref<128x128xbf16, #tpu.memory_space<vmem>>)
    %c2_i32_22 = arith.constant 2 : i32
    %29 = arith.addi %13, %c2_i32_22 : i32
    %c1_i32_23 = arith.constant 1 : i32
    %30 = arith.cmpi slt, %29, %c1_i32_23 : i32
    %31 = arith.extui %30 : i1 to i32
    %c0_i32_24 = arith.constant 0 : i32
    %32 = arith.cmpi ne, %31, %c0_i32_24 : i32
    scf.if %32 {
      %c2_i32_56 = arith.constant 2 : i32
      %73 = arith.addi %13, %c2_i32_56 : i32
      %c128_i32_57 = arith.constant 128 : i32
      %74 = arith.muli %73, %c128_i32_57 : i32
      %c0_i32_58 = arith.constant 0 : i32
      %75 = tpu.memref_slice %arg7[%74, %c0_i32_58] : memref<128x128xbf16, #tpu.memory_space<any>> -> memref<128x128xbf16, #tpu.memory_space<any>>
      %c0_i32_59 = arith.constant 0 : i32
      %c0_i32_60 = arith.constant 0 : i32
      %76 = tpu.memref_slice %arg9[%73, %c0_i32_59, %c0_i32_60] : memref<1x128x128xbf16, #tpu.memory_space<vmem>> -> memref<1x128x128xbf16, #tpu.memory_space<vmem>>
      %77 = tpu.memref_squeeze %76 : memref<1x128x128xbf16, #tpu.memory_space<vmem>> -> memref<128x128xbf16, #tpu.memory_space<vmem>>
      %78 = tpu.memref_slice %arg12[%23] : memref<2x!tpu.dma_semaphore, #tpu.memory_space<semaphore_mem>> -> memref<1x!tpu.dma_semaphore, #tpu.memory_space<semaphore_mem>>
      %79 = tpu.memref_squeeze %78 : memref<1x!tpu.dma_semaphore, #tpu.memory_space<semaphore_mem>> -> memref<!tpu.dma_semaphore, #tpu.memory_space<semaphore_mem>>
      tpu.enqueue_dma source(%75 : memref<128x128xbf16, #tpu.memory_space<any>>) target(%77 : memref<128x128xbf16, #tpu.memory_space<vmem>>) target_semaphore(%79 : memref<!tpu.dma_semaphore, #tpu.memory_space<semaphore_mem>>)
    } else {
    }
    %33 = arith.index_cast %13 : i32 to index
    %c0_25 = arith.constant 0 : index
    %c0_26 = arith.constant 0 : index
    %34 = vector.load %arg9[%33, %c0_25, %c0_26] : memref<1x128x128xbf16, #tpu.memory_space<vmem>>, vector<1x128x128xbf16>
    %35 = vector.shape_cast %34 : vector<1x128x128xbf16> to vector<128x128xbf16>
    %c0_27 = arith.constant 0 : index
    %c0_28 = arith.constant 0 : index
    %36 = vector.load %arg10[%c0_27, %c0_28] : memref<128x128xbf16, #tpu.memory_space<vmem>>, vector<128x128xbf16>
    %cst = arith.constant dense<0.000000e+00> : vector<128x128xf32>
    %37 = tpu.matmul %35, %36, %cst {dimension_numbers = #tpu.dot_dimension_numbers<[1], [0], [0], [1], [0, 0, 1, 1], [], []>} : vector<128x128xbf16>, vector<128x128xbf16>, vector<128x128xf32> -> vector<128x128xf32>
    %c0_29 = arith.constant 0 : index
    %c0_30 = arith.constant 0 : index
    %38 = vector.load %arg2[%c0_29, %c0_30] : memref<1x128xf32, #tpu.memory_space<vmem>>, vector<1x128xf32>
    %39 = vector.broadcast %38 : vector<1x128xf32> to vector<128x128xf32>
    %40 = arith.addf %37, %39 : vector<128x128xf32>
    %cst_31 = arith.constant 0.000000e+00 : f32
    %41 = vector.broadcast %cst_31 : f32 to vector<128x128xf32>
    %42 = arith.maximumf %40, %41 : vector<128x128xf32>
    %43 = arith.truncf %42 : vector<128x128xf32> to vector<128x128xbf16>
    %c128_i32 = arith.constant 128 : i32
    %44 = arith.muli %13, %c128_i32 : i32
    %45 = tpu.assume_multiple %44, 128 : i32
    %c0_32 = arith.constant 0 : index
    %c0_33 = arith.constant 0 : index
    %46 = vector.load %arg3[%c0_32, %c0_33] : memref<128x128xbf16, #tpu.memory_space<vmem>>, vector<128x128xbf16>
    %cst_34 = arith.constant dense<0.000000e+00> : vector<128x128xf32>
    %47 = tpu.matmul %43, %46, %cst_34 {dimension_numbers = #tpu.dot_dimension_numbers<[1], [0], [0], [1], [0, 0, 1, 1], [], []>} : vector<128x128xbf16>, vector<128x128xbf16>, vector<128x128xf32> -> vector<128x128xf32>
    %48 = arith.truncf %47 : vector<128x128xf32> to vector<128x128xbf16>
    %49 = arith.index_cast %45 : i32 to index
    %c0_35 = arith.constant 0 : index
    %50 = vector.load %arg11[%49, %c0_35] : memref<128x128xbf16, #tpu.memory_space<vmem>>, vector<128x128xbf16>
    tpu.vector_store %arg11[%49, %c0_35], %48 {strides = array<i32>} : memref<128x128xbf16, #tpu.memory_space<vmem>>, vector<128x128xbf16>,
    %c1_i32_36 = arith.constant 1 : i32
    %c0_i32_37 = arith.constant 0 : i32
    %c1_i32_38 = arith.constant 1 : i32
    %51 = arith.muli %c0_i32_37, %c1_i32_38 : i32
    %c0_i32_39 = arith.constant 0 : i32
    %52 = arith.addi %c0_i32_39, %51 : i32
    %53 = arith.index_cast %52 : i32 to index
    %c0_40 = arith.constant 0 : index
    %c0_41 = arith.constant 0 : index
    %54 = vector.load %arg9[%53, %c0_40, %c0_41] : memref<1x128x128xbf16, #tpu.memory_space<vmem>>, vector<1x128x128xbf16>
    %55 = vector.shape_cast %54 : vector<1x128x128xbf16> to vector<128x128xbf16>
    %c0_42 = arith.constant 0 : index
    %c0_43 = arith.constant 0 : index
    %56 = vector.load %arg11[%c0_42, %c0_43] : memref<128x128xbf16, #tpu.memory_space<vmem>>, vector<128x128xbf16>
    %cst_44 = arith.constant dense<0.000000e+00> : vector<128x128xf32>
    %57 = tpu.matmul %55, %56, %cst_44 {dimension_numbers = #tpu.dot_dimension_numbers<[1], [0], [0], [1], [0, 0, 1, 1], [], []>} : vector<128x128xbf16>, vector<128x128xbf16>, vector<128x128xf32> -> vector<128x128xf32>
    %c0_45 = arith.constant 0 : index
    %c0_46 = arith.constant 0 : index
    %58 = vector.load %arg4[%c0_45, %c0_46] : memref<1x128xf32, #tpu.memory_space<vmem>>, vector<1x128xf32>
    %59 = vector.broadcast %58 : vector<1x128xf32> to vector<128x128xf32>
    %60 = arith.addf %57, %59 : vector<128x128xf32>
    %cst_47 = arith.constant 0.000000e+00 : f32
    %61 = vector.broadcast %cst_47 : f32 to vector<128x128xf32>
    %62 = arith.maximumf %60, %61 : vector<128x128xf32>
    %63 = arith.truncf %62 : vector<128x128xf32> to vector<128x128xbf16>
    %c128_i32_48 = arith.constant 128 : i32
    %64 = arith.muli %52, %c128_i32_48 : i32
    %65 = tpu.assume_multiple %64, 128 : i32
    %c0_49 = arith.constant 0 : index
    %c0_50 = arith.constant 0 : index
    %66 = vector.load %arg5[%c0_49, %c0_50] : memref<128x128xbf16, #tpu.memory_space<vmem>>, vector<128x128xbf16>
    %cst_51 = arith.constant dense<0.000000e+00> : vector<128x128xf32>
    %67 = tpu.matmul %63, %66, %cst_51 {dimension_numbers = #tpu.dot_dimension_numbers<[1], [0], [0], [1], [0, 0, 1, 1], [], []>} : vector<128x128xbf16>, vector<128x128xbf16>, vector<128x128xf32> -> vector<128x128xf32>
    %c0_52 = arith.constant 0 : index
    %c0_53 = arith.constant 0 : index
    %68 = vector.load %arg6[%c0_52, %c0_53] : memref<1x128xf32, #tpu.memory_space<vmem>>, vector<1x128xf32>
    %69 = vector.broadcast %68 : vector<1x128xf32> to vector<128x128xf32>
    %70 = arith.addf %67, %69 : vector<128x128xf32>
    %71 = arith.index_cast %65 : i32 to index
    %c0_54 = arith.constant 0 : index
    %72 = vector.load %arg8[%71, %c0_54] : memref<128x128xf32, #tpu.memory_space<vmem>>, vector<128x128xf32>
    tpu.vector_store %arg8[%71, %c0_54], %70 {strides = array<i32>} : memref<128x128xf32, #tpu.memory_space<vmem>>, vector<128x128xf32>,
    %c1_i32_55 = arith.constant 1 : i32
    return
  }
}

</mosaic_0001>

<bundles_post_ra>
// kernel: tpu_custom_call.1
= control target key start
LH: loop header
LB: loop body
LE: loop exit
PB: predicated region body
PF: predicated region fallthrough
CT: control target
= control target key end

     0   :  { %v1312_v3 = vmov 0   ;;  %s1476_s0 = inlined_call_operand.vmem [shape: f32[128,1], index: 0, kind: input, shape index: {}]   ;;  %s1477_s1 = inlined_call_operand.vmem [shape: f32[1,128], index: 1, kind: input, shape index: {}]   ;;  %s1478_s2 = inlined_call_operand.vmem [shape: f32[1,128], index: 2, kind: input, shape index: {}]   ;;  %s1479_s3 = inlined_call_operand.vmem [shape: bf16[128,128], index: 3, kind: input, shape index: {}]   ;;  %s1480_s4 = inlined_call_operand.vmem [shape: f32[1,128], index: 4, kind: input, shape index: {}]   ;;  %s1481_s5 = inlined_call_operand.vmem [shape: bf16[128,128], index: 5, kind: input, shape index: {}]   ;;  %s1482_s6 = inlined_call_operand.vmem [shape: f32[1,128], index: 6, kind: input, shape index: {}]   ;;  %s1483_s7 = inlined_call_operand.hbm [shape: bf16[128,128], index: 7, kind: input, shape index: {}]   ;;  %s1484_s8 = inlined_call_operand.hbm [shape: f32[128,128], index: 8, kind: output, shape index: {}]  }
   0x1   :  { %v45_v0 = vld [vmem:[%s1476_s0 + $0x20] sm:$0xff]  ;;  %v43_v1 = vld [vmem:[%s1476_s0 + $0x10] sm:$0xff]  ;;  %1255 = vset.pattern.permute.xlu2 %v1312_v3  ;;  %1254 = vset.pattern.permute.xlu1 %v1312_v3 }
   0x2   :  { %v41_v2 = vld [vmem:[%s1476_s0] sm:$0xff]  ;;  %1253 = vset.pattern.permute.xlu0 %v1312_v3  ;;  %80 = vperm.xlu2 %1255, %v45_v0  }
   0x3   :  { %70 = vperm.xlu1 %1254, %v43_v1   ;;  %60 = vperm.xlu0 %1253, %v41_v2  }
   0x4   :  { %13 = vsyncpa [#allocation7], 0  ;;  %v46_v4 = vld [vmem:[%s1476_s0 + $0x28] sm:$0xff]  ;;  %v44_v5 = vld [vmem:[%s1476_s0 + $0x18] sm:$0xff]  ;;  %s35_s15 = sshll.u32 %s1483_s7, 4  ;;  %s1313_s16 = smov [#allocation2]   ;;  %s36_s15 = int_to_ptr.hbm [resolvable:$true] %s35_s15 }
   0x5   :  { %v42_v6 = vld [vmem:[%s1476_s0 + $0x8] sm:$0xff]  ;;  %v49_v7 = vld [vmem:[%s1476_s0 + $0x40] sm:$0xff]  ;;  %v48_v8 = vld [vmem:[%s1476_s0 + $0x38] sm:$0xff]  ;;  %s37_s17 = sshll.u32 %s1313_s16, 4  ;;  %s38_s17 = int_to_ptr.vmem [resolvable:$true] %s37_s17 }
   0x6   :  { %v47_v9 = vld [vmem:[%s1476_s0 + $0x30] sm:$0xff]  ;;  %v52_v10 = vld [vmem:[%s1476_s0 + $0x58] sm:$0xff]  ;;  %v50_v12 = vld [vmem:[%s1476_s0 + $0x48] sm:$0xff]  ;;  %40 = dma.hbm_to_vmem [thread:$0]  %s36_s15, 1024, %s38_s17, [#allocation5] }
   0x7   :  { %v51_v11 = vld [vmem:[%s1476_s0 + $0x50] sm:$0xff]  ;;  %v54_v14 = vld [vmem:[%s1476_s0 + $0x68] sm:$0xff]  ;;  %v53_v15 = vld [vmem:[%s1476_s0 + $0x60] sm:$0xff] }
   0x8   :  { %v55_v13 = vld [vmem:[%s1476_s0 + $0x70] sm:$0xff]  ;;  %v56_v16 = vld [vmem:[%s1476_s0 + $0x78] sm:$0xff]  ;;  %v1256_v18 = vld [vmem:[%s1477_s1] ss:$0 sm:$0xff] }
   0xa   :  { %85 = vperm.xlu2 %1255, %v46_v4  }
   0xb   :  { %75 = vperm.xlu1 %1254, %v44_v5   ;;  %65 = vperm.xlu0 %1253, %v42_v6  }
  0x12   :  { %100 = vperm.xlu2 %1255, %v49_v7  }
  0x13   :  { %95 = vperm.xlu1 %1254, %v48_v8   ;;  %90 = vperm.xlu0 %1253, %v47_v9  }
  0x1a   :  { %115 = vperm.xlu2 %1255, %v52_v10  }
  0x1b   :  { %110 = vperm.xlu1 %1254, %v51_v11   ;;  %105 = vperm.xlu0 %1253, %v50_v12  }
  0x22   :  { %130 = vperm.xlu2 %1255, %v55_v13  }
  0x23   :  { %125 = vperm.xlu1 %1254, %v54_v14   ;;  %120 = vperm.xlu0 %1253, %v53_v15  }
  0x2b   :  { %135 = vperm.xlu0 %1253, %v56_v16  }
  0x5c   :  { %v81_v17 = vpop.permute.xlu2 %80 }
  0x5d   :  { %v145_v19 = vmul.f32 %v1256_v18, %v81_v17 }
  0x64   :  { %v86_v20 = vpop.permute.xlu2 %85 }
  0x65   :  { %v146_v21 = vmul.f32 %v1256_v18, %v86_v20 }
  0x67   :  { %v1167_v22 = vpack.c.bf16 %v146_v21, %v145_v19 }
  0x69   :  { %1235 = vst [vmem:[#allocation3 + $0x18] sm:$0xff] %v1167_v22  }
  0x6c   :  { %v101_v33 = vpop.permute.xlu2 %100 }
  0x6d   :  { %v149_v42 = vmul.f32 %v1256_v18, %v101_v33 }
  0x74   :  { %v116_v39 = vpop.permute.xlu2 %115 }
  0x75   :  { %v71_v23 = vpop.permute.xlu1 %70  ;;  %v61_v24 = vpop.permute.xlu0 %60  ;;  %v152_v43 = vmul.f32 %v1256_v18, %v116_v39 }
  0x76   :  { %v143_v25 = vmul.f32 %v1256_v18, %v71_v23  ;;  %v141_v28 = vmul.f32 %v1256_v18, %v61_v24 }
  0x7c   :  { %v131_v53 = vpop.permute.xlu2 %130 }
  0x7d   :  { %v76_v26 = vpop.permute.xlu1 %75  ;;  %v66_v27 = vpop.permute.xlu0 %65  ;;  %v155_v55 = vmul.f32 %v1256_v18, %v131_v53 }
  0x7e   :  { %v144_v29 = vmul.f32 %v1256_v18, %v76_v26  ;;  %v142_v30 = vmul.f32 %v1256_v18, %v66_v27 }
  0x80   :  { %v1162_v31 = vpack.c.bf16 %v144_v29, %v143_v25  ;;  %v1157_v32 = vpack.c.bf16 %v142_v30, %v141_v28 }
  0x82   :  { %1234 = vst [vmem:[#allocation3] sm:$0xff] %v1162_v31  }
  0x83   :  { %1158 = vst [vmem:[#allocation3 + $0x30] sm:$0xff] %v1157_v32  }
  0x85   :  { %v96_v34 = vpop.permute.xlu1 %95  ;;  %v91_v35 = vpop.permute.xlu0 %90 }
  0x86   :  { %v148_v36 = vmul.f32 %v1256_v18, %v96_v34  ;;  %v147_v37 = vmul.f32 %v1256_v18, %v91_v35 }
  0x88   :  { %v1172_v38 = vpack.c.bf16 %v148_v36, %v147_v37 }
  0x8a   :  { %1236 = vst [vmem:[#allocation3 + $0x10] sm:$0xff] %v1172_v38  }
  0x8d   :  { %v111_v40 = vpop.permute.xlu1 %110  ;;  %v106_v41 = vpop.permute.xlu0 %105 }
  0x8e   :  { %v151_v44 = vmul.f32 %v1256_v18, %v111_v40  ;;  %v150_v45 = vmul.f32 %v1256_v18, %v106_v41 }
  0x90   :  { %v1182_v46 = vpack.c.bf16 %v152_v43, %v151_v44  ;;  %v1177_v47 = vpack.c.bf16 %v150_v45, %v149_v42 }
  0x92   :  { %1238 = vst [vmem:[#allocation3 + $0x20] sm:$0xff] %v1182_v46  }
  0x93   :  { %1237 = vst [vmem:[#allocation3 + $0x8] sm:$0xff] %v1177_v47  }
  0x95   :  { %v126_v48 = vpop.permute.xlu1 %125  ;;  %v121_v49 = vpop.permute.xlu0 %120 }
  0x96   :  { %v154_v50 = vmul.f32 %v1256_v18, %v126_v48  ;;  %v153_v51 = vmul.f32 %v1256_v18, %v121_v49 }
  0x98   :  { %v1187_v52 = vpack.c.bf16 %v154_v50, %v153_v51 }
  0x9a   :  { %1239 = vst [vmem:[#allocation3 + $0x28] sm:$0xff] %v1187_v52  }
  0x9d   :  { %v136_v54 = vpop.permute.xlu0 %135 }
  0x9e   :  { %v156_v56 = vmul.f32 %v1256_v18, %v136_v54 }
  0xa0   :  { %v1192_v57 = vpack.c.bf16 %v156_v56, %v155_v55 }
  0xa2   :  { %1240 = vst [vmem:[#allocation3 + $0x38] sm:$0xff] %v1192_v57  }
  0xa3   :  { %1308 = dma.done.wait [#allocation5], 1024 }
  0xa4   :  { %1309 = vsyncadd [#allocation5], 4294966272  ;;  %v1120_v59 = vld [vmem:[#allocation3 + $0x28] sm:$0xff]  ;;  %v1119_v60 = vld [vmem:[#allocation3 + $0x20] sm:$0xff]  ;;  %s887_s9 = sshll.u32 %s1484_s8, 4  ;;  %s1315_s10 = smov 128   ;;  %s888_s9 = int_to_ptr.hbm [resolvable:$true] %s887_s9 }
  0xa5   :  { %v1118_v61 = vld [vmem:[#allocation3 + $0x8] sm:$0xff]  ;;  %v1117_v62 = vld [vmem:[#allocation3 + $0x10] sm:$0xff]  ;;  %v1116_v63 = vld [vmem:[#allocation3 + $0x18] sm:$0xff]  ;;  %s1316_s11 = smov 8  }
  0xa6   :  { %v1115_v0 = vld [vmem:[#allocation3] sm:$0xff]  ;;  %v1114_v1 = vld [vmem:[#allocation3 + $0x30] sm:$0xff]  ;;  %v1107_v3 = vld [vmem:[#allocation2 + $0x8] sm:$0xff] }
  0xa7   :  { %v1106_v2 = vld [vmem:[#allocation2] sm:$0xff]  ;;  %v1108_v4 = vld [vmem:[#allocation2 + $0x10] sm:$0xff]  ;;  %v1109_v5 = vld [vmem:[#allocation2 + $0x18] sm:$0xff] }
  0xa8   :  { %v1110_v6 = vld [vmem:[#allocation2 + $0x20] sm:$0xff]  ;;  %v1129_v7 = vld [vmem:[%s1479_s3 + $0x38] sm:$0xff]  ;;  %v1111_v8 = vld [vmem:[#allocation2 + $0x28] sm:$0xff] }
  0xa9   :  { %v1121_v58 = vld [vmem:[#allocation3 + $0x38] sm:$0xff]  ;;  %462 = vmatpush.bf16.msra.mxu1 %v1129_v7  ;;  %v1128_v9 = vld [vmem:[%s1479_s3 + $0x30] sm:$0xff]  ;;  %v1127_v10 = vld [vmem:[%s1479_s3 + $0x28] sm:$0xff] }
  0xaa   :  { %325 = vmatpush.bf16.msra.mxu0 %v1121_v58  ;;  %v1126_v11 = vld [vmem:[%s1479_s3 + $0x20] sm:$0xff]  ;;  %v1125_v12 = vld [vmem:[%s1479_s3 + $0x18] sm:$0xff]  ;;  %v1112_v13 = vld [vmem:[#allocation2 + $0x30] sm:$0xff] }
  0xab   :  { %v1124_v14 = vld [vmem:[%s1479_s3 + $0x10] sm:$0xff]  ;;  %v1123_v15 = vld [vmem:[%s1479_s3 + $0x8] sm:$0xff]  ;;  %v1122_v16 = vld [vmem:[%s1479_s3] sm:$0xff] }
  0xac   :  { %v1113_v17 = vld [vmem:[#allocation2 + $0x38] sm:$0xff]  ;;  %v1257_v19 = vld [vmem:[%s1478_s2] ss:$0 sm:$0xff] }
  0xad   :  { %463 = vmatpush.bf16.msra.mxu1 %v1128_v9 }
  0xae   :  { %326 = vmatpush.bf16.msra.mxu0 %v1120_v59 }
  0xb1   :  { %464 = vmatpush.bf16.msra.mxu1 %v1127_v10 }
  0xb2   :  { %327 = vmatpush.bf16.msra.mxu0 %v1119_v60 }
  0xb5   :  { %465 = vmatpush.bf16.msra.mxu1 %v1126_v11 }
  0xb6   :  { %328 = vmatpush.bf16.msra.mxu0 %v1118_v61 }
  0xb9   :  { %466 = vmatpush.bf16.msra.mxu1 %v1125_v12 }
  0xba   :  { %329 = vmatpush.bf16.msra.mxu0 %v1117_v62 }
  0xbd   :  { %467 = vmatpush.bf16.msra.mxu1 %v1124_v14 }
  0xbe   :  { %330 = vmatpush.bf16.msra.mxu0 %v1116_v63 }
  0xc1   :  { %468 = vmatpush.bf16.msra.mxu1 %v1123_v15 }
  0xc2   :  { %331 = vmatpush.bf16.msra.mxu0 %v1115_v0 }
  0xc5   :  { %469 = vmatpush.bf16.msra.mxu1 %v1122_v16 }
  0xc6   :  { %332 = vmatpush.bf16.msra.mxu0 %v1114_v1 }
  0xc9   :  { %333 = vmatmul.bf16.vlgmr.msra.gmra.mxu0 %v1106_v2 }
  0xd9   :  { %338 = vmatmul.bf16.gmra.mxu0 %v1107_v3 }
  0xe9   :  { %343 = vmatmul.bf16.gmra.mxu0 %v1108_v4 }
  0xf9   :  { %348 = vmatmul.bf16.gmra.mxu0 %v1109_v5 }
 0x109   :  { %353 = vmatmul.bf16.gmra.mxu0 %v1110_v6 }
 0x119   :  { %358 = vmatmul.bf16.gmra.mxu0 %v1111_v8 }
 0x129   :  { %363 = vmatmul.bf16.gmra.mxu0 %v1112_v13 }
 0x139   :  { %368 = vmatmul.bf16.gmra.mxu0 %v1113_v17 }
 0x146   :  { %v334_v18 = vpop.f32.mrf.mxu0 }
 0x147   :  { %v335_v20 = vadd.f32 %v1257_v19, %v334_v18 }
 0x149   :  { %v374_v23 = vmax.f32 %v335_v20, 0.0 }
 0x14e   :  { %v336_v21 = vpop.f32.mrf.mxu0 }
 0x14f   :  { %v337_v22 = vadd.f32 %v1257_v19, %v336_v21 }
 0x151   :  { %v375_v24 = vmax.f32 %v337_v22, 0.0 }
 0x153   :  { %v390_v25 = vpack.c.bf16 %v375_v24, %v374_v23 }
 0x155   :  { %470 = vmatmul.bf16.vlgmr.msra.gmra.mxu1 %v390_v25 }
 0x156   :  { %v339_v26 = vpop.f32.mrf.mxu0 }
 0x157   :  { %v340_v27 = vadd.f32 %v1257_v19, %v339_v26 }
 0x159   :  { %v376_v30 = vmax.f32 %v340_v27, 0.0 }
 0x15e   :  { %v341_v28 = vpop.f32.mrf.mxu0 }
 0x15f   :  { %v342_v29 = vadd.f32 %v1257_v19, %v341_v28 }
 0x161   :  { %v377_v31 = vmax.f32 %v342_v29, 0.0 }
 0x163   :  { %v391_v32 = vpack.c.bf16 %v377_v31, %v376_v30 }
 0x165   :  { %475 = vmatmul.bf16.gmra.mxu1 %v391_v32 }
 0x166   :  { %v344_v33 = vpop.f32.mrf.mxu0 }
 0x167   :  { %v345_v34 = vadd.f32 %v1257_v19, %v344_v33 }
 0x169   :  { %v378_v37 = vmax.f32 %v345_v34, 0.0 }
 0x16e   :  { %v346_v35 = vpop.f32.mrf.mxu0 }
 0x16f   :  { %v347_v36 = vadd.f32 %v1257_v19, %v346_v35 }
 0x171   :  { %v379_v38 = vmax.f32 %v347_v36, 0.0 }
 0x173   :  { %v392_v39 = vpack.c.bf16 %v379_v38, %v378_v37 }
 0x175   :  { %480 = vmatmul.bf16.gmra.mxu1 %v392_v39 }
 0x176   :  { %v349_v40 = vpop.f32.mrf.mxu0 }
 0x177   :  { %v350_v41 = vadd.f32 %v1257_v19, %v349_v40 }
 0x179   :  { %v380_v44 = vmax.f32 %v350_v41, 0.0 }
 0x17e   :  { %v351_v42 = vpop.f32.mrf.mxu0 }
 0x17f   :  { %v352_v43 = vadd.f32 %v1257_v19, %v351_v42 }
 0x181   :  { %v381_v45 = vmax.f32 %v352_v43, 0.0  ;;  %v1130_v43 = vld [vmem:[#allocation2] sm:$0xff] }
 0x183   :  { %v393_v46 = vpack.c.bf16 %v381_v45, %v380_v44  ;;  %v1131_v44 = vld [vmem:[#allocation2 + $0x8] sm:$0xff]  ;;  %v1132_v45 = vld [vmem:[#allocation2 + $0x10] sm:$0xff] }
 0x185   :  { %485 = vmatmul.bf16.gmra.mxu1 %v393_v46  ;;  %v1133_v46 = vld [vmem:[#allocation2 + $0x18] sm:$0xff] }
 0x186   :  { %v354_v47 = vpop.f32.mrf.mxu0 }
 0x187   :  { %v355_v48 = vadd.f32 %v1257_v19, %v354_v47  ;;  %v1134_v47 = vld [vmem:[#allocation2 + $0x20] sm:$0xff] }
 0x189   :  { %v382_v51 = vmax.f32 %v355_v48, 0.0  ;;  %v1135_v48 = vld [vmem:[#allocation2 + $0x28] sm:$0xff] }
 0x18e   :  { %v356_v49 = vpop.f32.mrf.mxu0 }
 0x18f   :  { %v357_v50 = vadd.f32 %v1257_v19, %v356_v49  ;;  %v1153_v49 = vld [vmem:[%s1481_s5 + $0x38] sm:$0xff] }
 0x190   :  { %816 = vmatpush.bf16.msra.mxu3 %v1153_v49 }
 0x191   :  { %v383_v52 = vmax.f32 %v357_v50, 0.0  ;;  %v1152_v50 = vld [vmem:[%s1481_s5 + $0x30] sm:$0xff] }
 0x193   :  { %v394_v53 = vpack.c.bf16 %v383_v52, %v382_v51  ;;  %v1151_v51 = vld [vmem:[%s1481_s5 + $0x28] sm:$0xff]  ;;  %v1150_v52 = vld [vmem:[%s1481_s5 + $0x20] sm:$0xff] }
 0x194   :  { %817 = vmatpush.bf16.msra.mxu3 %v1152_v50 }
 0x195   :  { %490 = vmatmul.bf16.gmra.mxu1 %v394_v53  ;;  %v1136_v53 = vld [vmem:[#allocation2 + $0x30] sm:$0xff] }
 0x196   :  { %v359_v54 = vpop.f32.mrf.mxu0 }
 0x197   :  { %v360_v55 = vadd.f32 %v1257_v19, %v359_v54  ;;  %v1149_v54 = vld [vmem:[%s1481_s5 + $0x18] sm:$0xff] }
 0x198   :  { %818 = vmatpush.bf16.msra.mxu3 %v1151_v51 }
 0x199   :  { %v384_v58 = vmax.f32 %v360_v55, 0.0  ;;  %v1148_v55 = vld [vmem:[%s1481_s5 + $0x10] sm:$0xff] }
 0x19c   :  { %819 = vmatpush.bf16.msra.mxu3 %v1150_v52  ;;  %v1259_v52 = vld [vmem:[%s1482_s6] ss:$0 sm:$0xff]  ;;  %s1314_s6 = smov [#allocation6]  }
 0x19d   :  { %s885_s28 = sshll.u32 %s1314_s6, 4  ;;  %s886_s28 = int_to_ptr.vmem [resolvable:$true] %s885_s28 }
 0x19e   :  { %v361_v56 = vpop.f32.mrf.mxu0 }
 0x19f   :  { %v362_v57 = vadd.f32 %v1257_v19, %v361_v56  ;;  %v1147_v56 = vld [vmem:[%s1481_s5 + $0x8] sm:$0xff] }
 0x1a0   :  { %820 = vmatpush.bf16.msra.mxu3 %v1149_v54 }
 0x1a1   :  { %v385_v59 = vmax.f32 %v362_v57, 0.0  ;;  %v1137_v57 = vld [vmem:[#allocation2 + $0x38] sm:$0xff] }
 0x1a3   :  { %v395_v60 = vpack.c.bf16 %v385_v59, %v384_v58  ;;  %v1146_v58 = vld [vmem:[%s1481_s5] sm:$0xff] }
 0x1a4   :  { %821 = vmatpush.bf16.msra.mxu3 %v1148_v55 }
 0x1a5   :  { %495 = vmatmul.bf16.gmra.mxu1 %v395_v60  ;;  %v1258_v60 = vld [vmem:[%s1480_s4] ss:$0 sm:$0xff] }
 0x1a6   :  { %v364_v61 = vpop.f32.mrf.mxu0 }
 0x1a7   :  { %v365_v62 = vadd.f32 %v1257_v19, %v364_v61 }
 0x1a8   :  { %822 = vmatpush.bf16.msra.mxu3 %v1147_v56 }
 0x1a9   :  { %v386_v1 = vmax.f32 %v365_v62, 0.0 }
 0x1ac   :  { %823 = vmatpush.bf16.msra.mxu3 %v1146_v58 }
 0x1ae   :  { %v366_v63 = vpop.f32.mrf.mxu0 }
 0x1af   :  { %v367_v0 = vadd.f32 %v1257_v19, %v366_v63 }
 0x1b1   :  { %v387_v2 = vmax.f32 %v367_v0, 0.0 }
 0x1b3   :  { %v396_v3 = vpack.c.bf16 %v387_v2, %v386_v1 }
 0x1b5   :  { %500 = vmatmul.bf16.gmra.mxu1 %v396_v3 }
 0x1b6   :  { %v369_v4 = vpop.f32.mrf.mxu0 }
 0x1b7   :  { %v370_v5 = vadd.f32 %v1257_v19, %v369_v4 }
 0x1b9   :  { %v388_v8 = vmax.f32 %v370_v5, 0.0 }
 0x1be   :  { %v371_v6 = vpop.f32.mrf.mxu0 }
 0x1bf   :  { %v372_v7 = vadd.f32 %v1257_v19, %v371_v6 }
 0x1c1   :  { %v389_v9 = vmax.f32 %v372_v7, 0.0 }
 0x1c3   :  { %v397_v10 = vpack.c.bf16 %v389_v9, %v388_v8 }
 0x1c5   :  { %505 = vmatmul.bf16.gmra.mxu1 %v397_v10 }
 0x1d2   :  { %v471_v11 = vpop.f32.mrf.mxu1 }
 0x1da   :  { %v473_v12 = vpop.f32.mrf.mxu1 }
 0x1db   :  { %v1197_v13 = vpack.c.bf16 %v473_v12, %v471_v11 }
 0x1dd   :  { %1198 = vst [vmem:[#allocation4] sm:$0xff] %v1197_v13  }
 0x1e2   :  { %v476_v14 = vpop.f32.mrf.mxu1 }
 0x1e4   :  { %v1138_v42 = vld [vmem:[#allocation4] sm:$0xff] }
 0x1ea   :  { %v478_v15 = vpop.f32.mrf.mxu1 }
 0x1eb   :  { %v1202_v16 = vpack.c.bf16 %v478_v15, %v476_v14 }
 0x1ed   :  { %1241 = vst [vmem:[#allocation4 + $0x18] sm:$0xff] %v1202_v16  }
 0x1f2   :  { %v481_v17 = vpop.f32.mrf.mxu1 }
 0x1f4   :  { %v1139_v41 = vld [vmem:[#allocation4 + $0x18] sm:$0xff] }
 0x1fa   :  { %v483_v18 = vpop.f32.mrf.mxu1 }
 0x1fb   :  { %v1207_v20 = vpack.c.bf16 %v483_v18, %v481_v17 }
 0x1fd   :  { %1242 = vst [vmem:[#allocation4 + $0x10] sm:$0xff] %v1207_v20  }
 0x202   :  { %v486_v21 = vpop.f32.mrf.mxu1 }
 0x204   :  { %v1140_v40 = vld [vmem:[#allocation4 + $0x10] sm:$0xff] }
 0x20a   :  { %v488_v22 = vpop.f32.mrf.mxu1 }
 0x20b   :  { %v1212_v23 = vpack.c.bf16 %v488_v22, %v486_v21 }
 0x20d   :  { %1243 = vst [vmem:[#allocation4 + $0x20] sm:$0xff] %v1212_v23  }
 0x212   :  { %v491_v19 = vpop.f32.mrf.mxu1 }
 0x214   :  { %v1141_v39 = vld [vmem:[#allocation4 + $0x20] sm:$0xff] }
 0x21a   :  { %v493_v24 = vpop.f32.mrf.mxu1 }
 0x21b   :  { %v1217_v25 = vpack.c.bf16 %v493_v24, %v491_v19 }
 0x21d   :  { %1244 = vst [vmem:[#allocation4 + $0x28] sm:$0xff] %v1217_v25  }
 0x222   :  { %v496_v26 = vpop.f32.mrf.mxu1 }
 0x224   :  { %v1142_v38 = vld [vmem:[#allocation4 + $0x28] sm:$0xff] }
 0x22a   :  { %v498_v27 = vpop.f32.mrf.mxu1 }
 0x22b   :  { %v1222_v28 = vpack.c.bf16 %v498_v27, %v496_v26 }
 0x22d   :  { %1245 = vst [vmem:[#allocation4 + $0x8] sm:$0xff] %v1222_v28  }
 0x232   :  { %v501_v29 = vpop.f32.mrf.mxu1 }
 0x234   :  { %v1143_v37 = vld [vmem:[#allocation4 + $0x8] sm:$0xff] }
 0x23a   :  { %v503_v30 = vpop.f32.mrf.mxu1 }
 0x23b   :  { %v1227_v31 = vpack.c.bf16 %v503_v30, %v501_v29 }
 0x23d   :  { %1246 = vst [vmem:[#allocation4 + $0x30] sm:$0xff] %v1227_v31  }
 0x242   :  { %v506_v32 = vpop.f32.mrf.mxu1 }
 0x244   :  { %v1144_v36 = vld [vmem:[#allocation4 + $0x30] sm:$0xff] }
 0x24a   :  { %v508_v33 = vpop.f32.mrf.mxu1 }
 0x24b   :  { %v1232_v34 = vpack.c.bf16 %v508_v33, %v506_v32 }
 0x24d   :  { %1247 = vst [vmem:[#allocation4 + $0x38] sm:$0xff] %v1232_v34  }
 0x254   :  { %v1145_v35 = vld [vmem:[#allocation4 + $0x38] sm:$0xff] }
 0x255   :  { %675 = vmatpush.bf16.msra.mxu2 %v1145_v35 }
 0x259   :  { %676 = vmatpush.bf16.msra.mxu2 %v1144_v36 }
 0x25d   :  { %677 = vmatpush.bf16.msra.mxu2 %v1143_v37 }
 0x261   :  { %678 = vmatpush.bf16.msra.mxu2 %v1142_v38 }
 0x265   :  { %679 = vmatpush.bf16.msra.mxu2 %v1141_v39 }
 0x269   :  { %680 = vmatpush.bf16.msra.mxu2 %v1140_v40 }
 0x26d   :  { %681 = vmatpush.bf16.msra.mxu2 %v1139_v41 }
 0x271   :  { %682 = vmatpush.bf16.msra.mxu2 %v1138_v42 }
 0x274   :  { %683 = vmatmul.bf16.vlgmr.msra.gmra.mxu2 %v1130_v43 }
 0x284   :  { %688 = vmatmul.bf16.gmra.mxu2 %v1131_v44 }
 0x294   :  { %693 = vmatmul.bf16.gmra.mxu2 %v1132_v45 }
 0x2a4   :  { %698 = vmatmul.bf16.gmra.mxu2 %v1133_v46 }
 0x2b4   :  { %703 = vmatmul.bf16.gmra.mxu2 %v1134_v47 }
 0x2c4   :  { %708 = vmatmul.bf16.gmra.mxu2 %v1135_v48 }
 0x2d4   :  { %713 = vmatmul.bf16.gmra.mxu2 %v1136_v53 }
 0x2e4   :  { %718 = vmatmul.bf16.gmra.mxu2 %v1137_v57 }
 0x2f7   :  { %v684_v59 = vpop.f32.mrf.mxu2 }
 0x2f8   :  { %v685_v61 = vadd.f32 %v1258_v60, %v684_v59 }
 0x2fa   :  { %v724_v0 = vmax.f32 %v685_v61, 0.0 }
 0x2ff   :  { %v686_v62 = vpop.f32.mrf.mxu2 }
 0x300   :  { %v687_v63 = vadd.f32 %v1258_v60, %v686_v62 }
 0x302   :  { %v725_v1 = vmax.f32 %v687_v63, 0.0 }
 0x304   :  { %v740_v2 = vpack.c.bf16 %v725_v1, %v724_v0 }
 0x306   :  { %824 = vmatmul.bf16.vlgmr.msra.gmra.mxu3 %v740_v2 }
 0x307   :  { %v689_v3 = vpop.f32.mrf.mxu2 }
 0x308   :  { %v690_v4 = vadd.f32 %v1258_v60, %v689_v3 }
 0x30a   :  { %v726_v7 = vmax.f32 %v690_v4, 0.0 }
 0x30f   :  { %v691_v5 = vpop.f32.mrf.mxu2 }
 0x310   :  { %v692_v6 = vadd.f32 %v1258_v60, %v691_v5 }
 0x312   :  { %v727_v8 = vmax.f32 %v692_v6, 0.0 }
 0x314   :  { %v741_v9 = vpack.c.bf16 %v727_v8, %v726_v7 }
 0x316   :  { %829 = vmatmul.bf16.gmra.mxu3 %v741_v9 }
 0x317   :  { %v694_v10 = vpop.f32.mrf.mxu2 }
 0x318   :  { %v695_v11 = vadd.f32 %v1258_v60, %v694_v10 }
 0x31a   :  { %v728_v14 = vmax.f32 %v695_v11, 0.0 }
 0x31f   :  { %v696_v12 = vpop.f32.mrf.mxu2 }
 0x320   :  { %v697_v13 = vadd.f32 %v1258_v60, %v696_v12 }
 0x322   :  { %v729_v15 = vmax.f32 %v697_v13, 0.0 }
 0x324   :  { %v742_v16 = vpack.c.bf16 %v729_v15, %v728_v14 }
 0x326   :  { %834 = vmatmul.bf16.gmra.mxu3 %v742_v16 }
 0x327   :  { %v699_v17 = vpop.f32.mrf.mxu2 }
 0x328   :  { %v700_v18 = vadd.f32 %v1258_v60, %v699_v17 }
 0x32a   :  { %v730_v22 = vmax.f32 %v700_v18, 0.0 }
 0x32f   :  { %v701_v20 = vpop.f32.mrf.mxu2 }
 0x330   :  { %v702_v21 = vadd.f32 %v1258_v60, %v701_v20 }
 0x332   :  { %v731_v23 = vmax.f32 %v702_v21, 0.0 }
 0x334   :  { %v743_v19 = vpack.c.bf16 %v731_v23, %v730_v22 }
 0x336   :  { %839 = vmatmul.bf16.gmra.mxu3 %v743_v19 }
 0x337   :  { %v704_v24 = vpop.f32.mrf.mxu2 }
 0x338   :  { %v705_v25 = vadd.f32 %v1258_v60, %v704_v24 }
 0x33a   :  { %v732_v28 = vmax.f32 %v705_v25, 0.0 }
 0x33f   :  { %v706_v26 = vpop.f32.mrf.mxu2 }
 0x340   :  { %v707_v27 = vadd.f32 %v1258_v60, %v706_v26 }
 0x342   :  { %v733_v29 = vmax.f32 %v707_v27, 0.0 }
 0x344   :  { %v744_v30 = vpack.c.bf16 %v733_v29, %v732_v28 }
 0x346   :  { %844 = vmatmul.bf16.gmra.mxu3 %v744_v30 }
 0x347   :  { %v709_v31 = vpop.f32.mrf.mxu2 }
 0x348   :  { %v710_v32 = vadd.f32 %v1258_v60, %v709_v31 }
 0x34a   :  { %v734_v35 = vmax.f32 %v710_v32, 0.0 }
 0x34f   :  { %v711_v33 = vpop.f32.mrf.mxu2 }
 0x350   :  { %v712_v34 = vadd.f32 %v1258_v60, %v711_v33 }
 0x352   :  { %v735_v36 = vmax.f32 %v712_v34, 0.0 }
 0x354   :  { %v745_v37 = vpack.c.bf16 %v735_v36, %v734_v35 }
 0x356   :  { %849 = vmatmul.bf16.gmra.mxu3 %v745_v37 }
 0x357   :  { %v714_v38 = vpop.f32.mrf.mxu2 }
 0x358   :  { %v715_v39 = vadd.f32 %v1258_v60, %v714_v38 }
 0x35a   :  { %v736_v42 = vmax.f32 %v715_v39, 0.0 }
 0x35f   :  { %v716_v40 = vpop.f32.mrf.mxu2 }
 0x360   :  { %v717_v41 = vadd.f32 %v1258_v60, %v716_v40 }
 0x362   :  { %v737_v43 = vmax.f32 %v717_v41, 0.0 }
 0x364   :  { %v746_v44 = vpack.c.bf16 %v737_v43, %v736_v42 }
 0x366   :  { %854 = vmatmul.bf16.gmra.mxu3 %v746_v44 }
 0x367   :  { %v719_v45 = vpop.f32.mrf.mxu2 }
 0x368   :  { %v720_v46 = vadd.f32 %v1258_v60, %v719_v45 }
 0x36a   :  { %v738_v49 = vmax.f32 %v720_v46, 0.0 }
 0x36f   :  { %v721_v47 = vpop.f32.mrf.mxu2 }
 0x370   :  { %v722_v48 = vadd.f32 %v1258_v60, %v721_v47 }
 0x372   :  { %v739_v50 = vmax.f32 %v722_v48, 0.0 }
 0x374   :  { %v747_v51 = vpack.c.bf16 %v739_v50, %v738_v49 }
 0x376   :  { %859 = vmatmul.bf16.gmra.mxu3 %v747_v51 }
 0x389   :  { %v825_v53 = vpop.f32.mrf.mxu3 }
 0x38a   :  { %v826_v54 = vadd.f32 %v1259_v52, %v825_v53 }
 0x38c   :  { %865 = vst [vmem:[#allocation6] sm:$0xff] %v826_v54 }
 0x391   :  { %v827_v55 = vpop.f32.mrf.mxu3 }
 0x392   :  { %v828_v56 = vadd.f32 %v1259_v52, %v827_v55 }
 0x394   :  { %866 = vst [vmem:[#allocation6 + $0x8] sm:$0xff] %v828_v56 }
 0x399   :  { %v830_v57 = vpop.f32.mrf.mxu3 }
 0x39a   :  { %v831_v58 = vadd.f32 %v1259_v52, %v830_v57 }
 0x39c   :  { %867 = vst [vmem:[#allocation6 + $0x10] sm:$0xff] %v831_v58 }
 0x3a1   :  { %v832_v59 = vpop.f32.mrf.mxu3 }
 0x3a2   :  { %v833_v61 = vadd.f32 %v1259_v52, %v832_v59 }
 0x3a4   :  { %868 = vst [vmem:[#allocation6 + $0x18] sm:$0xff] %v833_v61 }
 0x3a9   :  { %v835_v60 = vpop.f32.mrf.mxu3 }
 0x3aa   :  { %v836_v62 = vadd.f32 %v1259_v52, %v835_v60 }
 0x3ac   :  { %869 = vst [vmem:[#allocation6 + $0x20] sm:$0xff] %v836_v62 }
 0x3b1   :  { %v837_v63 = vpop.f32.mrf.mxu3 }
 0x3b2   :  { %v838_v0 = vadd.f32 %v1259_v52, %v837_v63 }
 0x3b4   :  { %870 = vst [vmem:[#allocation6 + $0x28] sm:$0xff] %v838_v0 }
 0x3b9   :  { %v840_v1 = vpop.f32.mrf.mxu3 }
 0x3ba   :  { %v841_v2 = vadd.f32 %v1259_v52, %v840_v1 }
 0x3bc   :  { %871 = vst [vmem:[#allocation6 + $0x30] sm:$0xff] %v841_v2 }
 0x3c1   :  { %v842_v3 = vpop.f32.mrf.mxu3 }
 0x3c2   :  { %v843_v4 = vadd.f32 %v1259_v52, %v842_v3 }
 0x3c4   :  { %872 = vst [vmem:[#allocation6 + $0x38] sm:$0xff] %v843_v4 }
 0x3c9   :  { %v845_v5 = vpop.f32.mrf.mxu3 }
 0x3ca   :  { %v846_v6 = vadd.f32 %v1259_v52, %v845_v5 }
 0x3cc   :  { %873 = vst [vmem:[#allocation6 + $0x40] sm:$0xff] %v846_v6 }
 0x3d1   :  { %v847_v7 = vpop.f32.mrf.mxu3 }
 0x3d2   :  { %v848_v8 = vadd.f32 %v1259_v52, %v847_v7 }
 0x3d4   :  { %874 = vst [vmem:[#allocation6 + $0x48] sm:$0xff] %v848_v8 }
 0x3d9   :  { %v850_v9 = vpop.f32.mrf.mxu3 }
 0x3da   :  { %v851_v10 = vadd.f32 %v1259_v52, %v850_v9 }
 0x3dc   :  { %875 = vst [vmem:[#allocation6 + $0x50] sm:$0xff] %v851_v10 }
 0x3e1   :  { %v852_v11 = vpop.f32.mrf.mxu3 }
 0x3e2   :  { %v853_v12 = vadd.f32 %v1259_v52, %v852_v11 }
 0x3e4   :  { %876 = vst [vmem:[#allocation6 + $0x58] sm:$0xff] %v853_v12 }
 0x3e9   :  { %v855_v13 = vpop.f32.mrf.mxu3 }
 0x3ea   :  { %v856_v14 = vadd.f32 %v1259_v52, %v855_v13 }
 0x3ec   :  { %877 = vst [vmem:[#allocation6 + $0x60] sm:$0xff] %v856_v14 }
 0x3f1   :  { %v857_v15 = vpop.f32.mrf.mxu3 }
 0x3f2   :  { %v858_v16 = vadd.f32 %v1259_v52, %v857_v15 }
 0x3f4   :  { %878 = vst [vmem:[#allocation6 + $0x68] sm:$0xff] %v858_v16 }
 0x3f9   :  { %v860_v17 = vpop.f32.mrf.mxu3 }
 0x3fa   :  { %v861_v18 = vadd.f32 %v1259_v52, %v860_v17 }
 0x3fc   :  { %879 = vst [vmem:[#allocation6 + $0x70] sm:$0xff] %v861_v18 }
 0x401   :  { %v862_v20 = vpop.f32.mrf.mxu3 }
 0x402   :  { %v863_v21 = vadd.f32 %v1259_v52, %v862_v20 }
 0x404   :  { %880 = vst [vmem:[#allocation6 + $0x78] sm:$0xff] %v863_v21 }
 0x405   :  { %893 = dma.vmem_to_hbm [thread:$0]  %s886_s28, 2048, %s888_s9, [#allocation7], %s1315_s10, %s1315_s10, %s1316_s11  }
 0x406   :  { %1310 = dma.done.wait [#allocation7], 2048  }
 0x407   :  { %1311 = vsyncadd [#allocation7], 4294965248 }
 0x408   :  { %898 = vsyncpa [#allocation7], 1 }
 0x409   :  { %899 = vsyncmov [#allocation5] }
 0x40c   :  { %s900_s12 = vpop.sfrf %899 }
 0x40d   :  { %p1104_p0 = scmp.ne.s32.totalorder %s900_s12, 0 }
 0x40f   :  { %904 = shalt.err (%p1104_p0)  }
 0x410   :  { %906 = vsyncmov [#allocation5 + $0x1] }
 0x413   :  { %s907_s13 = vpop.sfrf %906 }
 0x414   :  { %p1105_p1 = scmp.ne.s32.totalorder %s907_s13, 0 }
 0x416   :  { %911 = shalt.err (%p1105_p1)  }

</bundles_post_ra>
